<compile_context>
chip_gen: v7x
topology: tpu7x:2x2x1
jax: 0.10.0
libtpu: 0.0.40
codegen_flags: <defaults>
</compile_context>

<pallas_src>
import functools

import jax
import jax.numpy as jnp
from jax import lax
from jax.experimental import pallas as pl
from jax.experimental.pallas import tpu as pltpu


def _sse_partial_kernel(x_ref, xr_ref, o_ref, *, tr, lanes, group, total_rows,
                        ragged, unroll):
    """Sum of squared diffs of one (tr, lanes) block -> (8, 128) f32 partial."""
    n_groups = tr // group

    def fold_into_acc(acc, d2):
        # Fold a (group, lanes) tile of squared diffs into the (8, lanes) acc
        # (for bf16/int8 this adds the 2/4 unpacked 8-row halves of the group).
        for s0 in range(0, group, 8):
            acc = acc + d2[s0:s0 + 8, :]
        return acc

    def lane_fold_and_store(acc):
        # Fold lane groups down to a single (8, 128) tile (vreg-aligned slices).
        q = acc[:, 0:128]
        for c in range(128, lanes, 128):
            q = q + acc[:, c:c + 128]
        o_ref[...] = q

    def run(masked):
        row_base = pl.program_id(0) * tr
        # Hoisted out of the loop (JAX does not CSE broadcast_in_dim).
        sub_iota = (lax.broadcasted_iota(jnp.int32, (group, lanes), 0)
                    if masked else None)

        def body(g, acc):
            r0 = pl.multiple_of(g * group, group)
            xs = x_ref[pl.ds(r0, group), :].astype(jnp.float32)
            rs = xr_ref[pl.ds(r0, group), :].astype(jnp.float32)
            d = rs - xs
            if masked:
                # Zero out-of-range rows BEFORE the multiply so garbage in the
                # partially out-of-bounds last block (possibly NaN/Inf) never
                # reaches the accumulator.
                d = jnp.where(row_base + r0 + sub_iota < total_rows, d, 0.0)
            return fold_into_acc(acc, d * d)

        acc = jnp.zeros((8, lanes), jnp.float32)
        acc = lax.fori_loop(0, n_groups, body, acc, unroll=unroll)
        lane_fold_and_store(acc)

    if not ragged:
        run(masked=False)
    else:
        last = pl.num_programs(0) - 1

        @pl.when(pl.program_id(0) != last)
        def _():
            run(masked=False)

        @pl.when(pl.program_id(0) == last)
        def _():
            run(masked=True)


def reconstruction_loss(x, x_recont, *, target_block_bytes=4 * 1024 * 1024):
    """MSE between x (flattened) and x_recont, matching torch.mean((xr - x)**2)."""
    assert x.size == x_recont.size, "element counts must match"
    n_total = x.size
    inv_n = 1.0 / float(n_total)

    xf = x.reshape(-1)
    rf = x_recont.reshape(-1)
    N = xf.size

    x_item = x.dtype.itemsize
    r_item = x_recont.dtype.itemsize
    # Row-group = sublane packing of the narrowest input dtype (8 f32 / 16 bf16 /
    # 32 int8) so whole packed vregs are loaded; block bytes use the widest.
    group = max(8, 32 // min(x_item, r_item))
    blk_item = max(x_item, r_item)

    # Lane width: prefer one that divides N exactly (pure bitcast reshape, no
    # copies); otherwise fall back to 128 with a <128-element sliver in JAX.
    L = 0
    for cand in (1024, 512, 256, 128):
        if N % cand == 0 and N // cand >= group:
            L = cand
            break
    if L == 0 and N // 128 >= group:
        L = 128
    if L == 0:
        # Degenerate tiny input: nothing worth tiling; single fused JAX pass.
        d = rf.astype(jnp.float32) - xf.astype(jnp.float32)
        return jnp.sum(d * d) * inv_n

    R = N // L
    n_main = R * L
    sliver = N - n_main

    # Rows per block: ~target_block_bytes per input (dtype-aware), multiple of
    # the packing `group`, never more than the available full groups.
    TR = max(group, target_block_bytes // (L * blk_item))
    TR = (TR // group) * group
    TR = min(TR, (R // group) * group)

    G = (R + TR - 1) // TR
    # v7x megacore: prefer >= 2 grid steps so the "parallel" axis actually
    # splits across both TensorCores, as long as blocks stay >= ~512 KiB/input.
    if G == 1:
        half = ((R // 2) // group) * group
        if half >= group and half * L * blk_item >= 512 * 1024:
            TR = half
            G = (R + TR - 1) // TR

    ragged = (R % TR) != 0

    if sliver == 0:
        x2 = xf.reshape(R, L)   # contiguous reshape: bitcast, no HBM copy
        r2 = rf.reshape(R, L)
    else:
        # TODO(synk): for N % 128 != 0 this prefix slice materialises a copy of
        # both inputs (still cheaper than the old pad of the full padded size);
        # the <128-element sliver itself is reduced in plain JAX below.
        x2 = xf[:n_main].reshape(R, L)
        r2 = rf[:n_main].reshape(R, L)

    kernel = functools.partial(
        _sse_partial_kernel, tr=TR, lanes=L, group=group, total_rows=R,
        ragged=ragged, unroll=max(1, min(8, TR // group)))

    # 2 inputs x 2 pipeline buffers x block, plus headroom; capped for v7x's
    # smaller (64 MiB) physical VMEM.
    block_bytes = TR * L * blk_item
    vmem_limit = int(min(48 << 20, max(32 << 20, 4 * block_bytes + (8 << 20))))

    partials = pl.pallas_call(
        kernel,
        out_shape=jax.ShapeDtypeStruct((G * 8, 128), jnp.float32),
        grid=(G,),
        in_specs=[
            pl.BlockSpec((TR, L), lambda i: (i, 0)),
            pl.BlockSpec((TR, L), lambda i: (i, 0)),
        ],
        out_specs=pl.BlockSpec((8, 128), lambda i: (i, 0)),
        compiler_params=pltpu.CompilerParams(
            dimension_semantics=("parallel",),
            vmem_limit_bytes=vmem_limit,
        ),
    )(x2, r2)

    total = jnp.sum(partials)
    if sliver > 0:
        dt = rf[n_main:].astype(jnp.float32) - xf[n_main:].astype(jnp.float32)
        total = total + jnp.sum(dt * dt)
    return total * inv_n


if __name__ == "__main__":
    key = jax.random.PRNGKey(0)
    k1, k2 = jax.random.split(key)

    # x is e.g. an image batch NCHW; x_recont is the flat reconstruction (B, C*H*W).
    B, C, H, W = 2, 4, 16, 16
    x = jax.random.normal(k1, (B, C, H, W), dtype=jnp.float32)
    x_recont = jax.random.normal(k2, (B, C * H * W), dtype=jnp.float32)

    loss = reconstruction_loss(x, x_recont)
    loss = jax.block_until_ready(loss)

    # Reference check in plain JAX.
    ref = jnp.mean((x_recont - x.reshape(B, -1)) ** 2)
    assert jnp.allclose(loss, ref, rtol=1e-5, atol=1e-6), (loss, ref)

    print("KERNEL_OK")
</pallas_src>

<mosaic_0001>
module attributes {stable_mosaic.version = 11 : i64} {
  func.func @_sse_partial_kernel(%arg0: i32, %arg1: memref<8x256xf32, #tpu.memory_space<vmem>>, %arg2: memref<8x256xf32, #tpu.memory_space<vmem>>, %arg3: memref<8x128xf32, #tpu.memory_space<vmem>>) attributes {dimension_semantics = [#tpu.dimension_semantics<parallel>], iteration_bounds = array<i64: 1>, scalar_prefetch = 0 : i64, scratch_operands = 0 : i64, tpu.core_type = #tpu.core_type<tc>, window_params = [{transform_indices = @transform_0, window_bounds = array<i64: 8, 256>}, {transform_indices = @transform_1, window_bounds = array<i64: 8, 256>}, {transform_indices = @transform_2, window_bounds = array<i64: 8, 128>}]} {
    %cst = arith.constant 0.000000e+00 : f32
    %0 = vector.broadcast %cst : f32 to vector<8x256xf32>
    %c0_i32 = arith.constant 0 : i32
    %c8_i32 = arith.constant 8 : i32
    %1 = arith.muli %c0_i32, %c8_i32 : i32
    %2 = tpu.assume_multiple %1, 8 : i32
    %3 = arith.index_cast %2 : i32 to index
    %c0 = arith.constant 0 : index
    %4 = vector.load %arg1[%3, %c0] : memref<8x256xf32, #tpu.memory_space<vmem>>, vector<8x256xf32>
    %5 = arith.index_cast %2 : i32 to index
    %c0_0 = arith.constant 0 : index
    %6 = vector.load %arg2[%5, %c0_0] : memref<8x256xf32, #tpu.memory_space<vmem>>, vector<8x256xf32>
    %7 = arith.subf %6, %4 : vector<8x256xf32>
    %8 = arith.mulf %7, %7 : vector<8x256xf32>
    %9 = arith.addf %0, %8 : vector<8x256xf32>
    %c1_i32 = arith.constant 1 : i32
    %10 = vector.extract_strided_slice %9 {offsets = [0, 0], sizes = [8, 128], strides = [1, 1]} : vector<8x256xf32> to vector<8x128xf32>
    %11 = vector.extract_strided_slice %9 {offsets = [0, 128], sizes = [8, 128], strides = [1, 1]} : vector<8x256xf32> to vector<8x128xf32>
    %12 = arith.addf %10, %11 : vector<8x128xf32>
    %c0_1 = arith.constant 0 : index
    %c0_2 = arith.constant 0 : index
    %13 = vector.load %arg3[%c0_1, %c0_2] : memref<8x128xf32, #tpu.memory_space<vmem>>, vector<8x128xf32>
    tpu.vector_store %arg3[%c0_1, %c0_2], %12 {strides = array<i32>} : memref<8x128xf32, #tpu.memory_space<vmem>>, vector<8x128xf32>,
    return
  }
  func.func @transform_0(%arg0: i32) -> (i32, i32) {
    %c0_i32 = arith.constant 0 : i32
    %c0_i32_0 = arith.constant 0 : i32
    return %arg0, %c0_i32 : i32, i32
  }
  func.func @transform_1(%arg0: i32) -> (i32, i32) {
    %c0_i32 = arith.constant 0 : i32
    %c0_i32_0 = arith.constant 0 : i32
    return %arg0, %c0_i32 : i32, i32
  }
  func.func @transform_2(%arg0: i32) -> (i32, i32) {
    %c0_i32 = arith.constant 0 : i32
    %c0_i32_0 = arith.constant 0 : i32
    return %arg0, %c0_i32 : i32, i32
  }
}

</mosaic_0001>

<bundles_post_ra>
// kernel: tpu_custom_call.1
= control target key start
LH: loop header
LB: loop body
LE: loop exit
PB: predicated region body
PF: predicated region fallthrough
CT: control target
= control target key end

     0   :  { %7 = vsyncpa [#allocation3], 0  ;;  %s198_s0 = inlined_call_operand.hbm [shape: f32[8,256], index: 0, kind: input, shape index: {}]   ;;  %s199_s1 = inlined_call_operand.hbm [shape: f32[8,256], index: 1, kind: input, shape index: {}]   ;;  %s200_s2 = inlined_call_operand.hbm [shape: f32[8,128], index: 2, kind: output, shape index: {}]  }
   0x1   :  { %8 = vsyncpa [#allocation6], 0 }
   0x2   :  { %9 = vsyncpa [#allocation4], 0  ;;  %s144_s9 = smov [#allocation2]   ;;  %s145_s11 = smov [#allocation5]  }
   0x3   :  { %s16_s10 = sshll.u32 %s144_s9, 4  ;;  %s26_s12 = sshll.u32 %s145_s11, 4  ;;  %s17_s10 = int_to_ptr.vmem [resolvable:$true] %s16_s10  ;;  %s27_s12 = int_to_ptr.vmem [resolvable:$true] %s26_s12 }
   0x4   :  { %s72_s15 = scalar_lea.hbm %s198_s0, 256 }
   0x5   :  { %p73_p0 = scmp.ne.s32.totalorder %s198_s0, %s72_s15  ;;  %p76_p1 = scmp.lt.u32.totalorder %s72_s15, %s198_s0 }
   0x7   :  { %p78_p2 = pnand %p76_p1, %p73_p0 }
   0x9   :  { %81 = shalt.err (!%p78_p2)
}
   0xa   :  { %s82_s20 = scalar_lea.vmem %s17_s10, 256  ;;  %p87_p4 = scmp.lt.s32.totalorder %s17_s10, %s17_s10 }
   0xb   :  { %p83_p3 = scmp.ne.s32.totalorder %s17_s10, %s82_s20  ;;  %p88_p5 = scmp.lt.s32.totalorder %s82_s20, %s82_s20 }
   0xd   :  { %p89_p6 = por %p88_p5, %p87_p4 }
   0xf   :  { %p90_p7 = pnand %p89_p6, %p83_p3 }
  0x11   :  { %93 = shalt.err (!%p90_p7)
}
  0x12   :  { %19 = dma.hbm_to_vmem [thread:$0]  %s198_s0, 256, %s17_s10, [#allocation3]  }
  0x13   :  { %s94_s25 = scalar_lea.hbm %s199_s1, 256 }
  0x14   :  { %p95_p8 = scmp.ne.s32.totalorder %s199_s1, %s94_s25  ;;  %p98_p9 = scmp.lt.u32.totalorder %s94_s25, %s199_s1 }
  0x16   :  { %p100_p10 = pnand %p98_p9, %p95_p8 }
  0x18   :  { %103 = shalt.err (!%p100_p10)
}
  0x19   :  { %s104_s30 = scalar_lea.vmem %s27_s12, 256  ;;  %p109_p12 = scmp.lt.s32.totalorder %s27_s12, %s27_s12 }
  0x1a   :  { %p105_p11 = scmp.ne.s32.totalorder %s27_s12, %s104_s30  ;;  %p110_p13 = scmp.lt.s32.totalorder %s104_s30, %s104_s30 }
  0x1c   :  { %p111_p0 = por %p110_p13, %p109_p12 }
  0x1e   :  { %p112_p1 = pnand %p111_p0, %p105_p11 }
  0x20   :  { %115 = shalt.err (!%p112_p1)
}
  0x21   :  { %29 = dma.hbm_to_vmem [thread:$0]  %s199_s1, 256, %s27_s12, [#allocation6]  }
  0x22   :  { %138 = dma.done.wait [#allocation3], 256  }
  0x23   :  { %139 = vsyncadd [#allocation3], 4294967040 }
  0x24   :  { %140 = dma.done.wait [#allocation6], 256  }
  0x25   :  { %141 = vsyncadd [#allocation6], 4294967040  ;;  %v39_v0 = vld [vmem:[#allocation2] sm:$0xff]  ;;  %v40_v1 = vld [vmem:[#allocation2 + $0x8] sm:$0xff]  ;;  %s146_s4 = smov [#allocation7]  }
  0x26   :  { %v43_v2 = vld [vmem:[#allocation5] sm:$0xff]  ;;  %v44_v3 = vld [vmem:[#allocation5 + $0x8] sm:$0xff]  ;;  %s59_s5 = sshll.u32 %s146_s4, 4  ;;  %s60_s5 = int_to_ptr.vmem [resolvable:$true] %s59_s5 }
  0x27   :  { %v45_v4 = vsub.f32 %v43_v2, %v39_v0  ;;  %v46_v5 = vsub.f32 %v44_v3, %v40_v1  ;;  %s116_s6 = scalar_lea.vmem %s60_s5, 128  ;;  %p121_p3 = scmp.lt.s32.totalorder %s60_s5, %s60_s5 }
  0x28   :  { %p117_p2 = scmp.ne.s32.totalorder %s60_s5, %s116_s6  ;;  %p122_p4 = scmp.lt.s32.totalorder %s116_s6, %s116_s6 }
  0x29   :  { %v47_v6 = vmul.f32 %v45_v4, %v45_v4  ;;  %v48_v7 = vmul.f32 %v46_v5, %v46_v5 }
  0x2a   :  { %p123_p5 = por %p122_p4, %p121_p3 }
  0x2b   :  { %v51_v8 = vadd.f32 %v48_v7, %v47_v6 }
  0x2c   :  { %p124_p6 = pnand %p123_p5, %p117_p2 }
  0x2d   :  { %52 = vst [vmem:[#allocation7] sm:$0xff] %v51_v8 }
  0x2e   :  { %127 = shalt.err (!%p124_p6)
}
  0x2f   :  { %s128_s8 = scalar_lea.hbm %s200_s2, 128 }
  0x30   :  { %p129_p7 = scmp.ne.s32.totalorder %s200_s2, %s128_s8  ;;  %p132_p8 = scmp.lt.u32.totalorder %s128_s8, %s200_s2 }
  0x32   :  { %p134_p9 = pnand %p132_p8, %p129_p7 }
  0x34   :  { %137 = shalt.err (!%p134_p9)
}
  0x35   :  { %62 = dma.vmem_to_hbm [thread:$0]  %s60_s5, 128, %s200_s2, [#allocation4]  }
  0x36   :  { %142 = dma.done.wait [#allocation4], 128  }
  0x37   :  { %143 = vsyncadd [#allocation4], 4294967168 }
  0x38   :  { %66 = vsyncpa [#allocation3], 1 }
  0x39   :  { %67 = vsyncpa [#allocation6], 1 }
  0x3a   :  { %68 = vsyncpa [#allocation4], 1 }

</bundles_post_ra>
